<compile_context>
chip_gen: v6e
topology: v6e:2x2x1
jax: 0.10.0
libtpu: 0.0.40
codegen_flags: <defaults>
</compile_context>

<pallas_src>
import jax
import jax.numpy as jnp
from jax.experimental import pallas as pl
from jax.experimental.pallas import tpu as pltpu

LANE = 128
_EXP_CLAMP = 20.0            # exp(20) ~ 4.85e8 -> e*(e+2) ~ 2.4e17, finite in f32, ts == 1.0
_BLOCK_BYTES = 6 << 20       # ~6 MiB of input per grid step -> ~24 MiB VMEM footprint
_SPLIT_MIN_BYTES = 1 << 20   # split single-block inputs >= 1 MiB so both v7x TCs run
_VMEM_LIMIT = 32 * 1024 * 1024


def _sublane(dtype) -> int:
    """Native sublane tiling for the dtype: 8 (f32), 16 (bf16/f16), 32 (int8/fp8)."""
    bits = jnp.dtype(dtype).itemsize * 8
    return max(8, 256 // bits)


def _mish_kernel(x_ref, o_ref):
    xf = x_ref[...].astype(jnp.float32)
    # tanh(softplus(x)) = ((1+e)^2 - 1) / ((1+e)^2 + 1) = e*(e+2) / (e*(e+2) + 2),
    # e = exp(x).  One exp (EUP) + one approx reciprocal (EUP) + VPU mul/add; the
    # e*(e+2) form keeps the small-e tail exact (Mish -> x * e^x for very negative x).
    e = jnp.exp(jnp.minimum(xf, _EXP_CLAMP))
    num = e * (e + 2.0)
    den = num + 2.0
    inv = pl.reciprocal(den, approx=True)
    inv = inv * (2.0 - den * inv)          # one Newton step: ~f32-exact 1/den, pure VPU
    o_ref[...] = (xf * (num * inv)).astype(o_ref.dtype)


def mish(x):
    """Applies Mish(x) = x * tanh(softplus(x)) elementwise (any shape, float dtype)."""
    orig_shape = x.shape
    orig_dtype = x.dtype
    n = x.size
    if n == 0:
        return x
    itemsize = jnp.dtype(orig_dtype).itemsize
    sub = _sublane(orig_dtype)

    # ---- lane-dense 2-D layout; avoid pad/slice whenever the size allows it ----
    pad = 0
    if n < LANE:
        cols = n                              # single tiny block == full array dims
    else:
        cols = 0
        for c in (2048, 1024, 512, 256, 128):
            if n % c == 0:
                cols = c
                break
        if cols == 0:
            # Unavoidable fallback (n not a multiple of 128): pad to a full 128-lane row.
            cols = LANE
            pad = (-n) % cols
    rows = (n + pad) // cols

    flat = x.reshape(-1)
    if pad:
        flat = jnp.pad(flat, (0, pad))        # Mish(0) == 0, padding is harmless
    x2d = flat.reshape(rows, cols)

    # ---- block sizing ----
    total_bytes = n * itemsize
    row_bytes = cols * itemsize
    tile_rows = max(sub, (_BLOCK_BYTES // row_bytes) // sub * sub)

    num_blocks = pl.cdiv(rows, tile_rows)
    if num_blocks == 1 and rows >= 2 * sub and total_bytes >= _SPLIT_MIN_BYTES:
        num_blocks = 2                        # give both v7x TensorCores work
    if num_blocks > 1:
        # Rebalance so blocks are near-equal and sublane-aligned (partial last block
        # is handled by Pallas; block shape stays (multiple-of-sub, multiple-of-128)).
        tile_rows = pl.cdiv(pl.cdiv(rows, num_blocks), sub) * sub
        num_blocks = pl.cdiv(rows, tile_rows)
    else:
        tile_rows = rows                      # single block == full array dims

    grid = (num_blocks,)

    out2d = pl.pallas_call(
        _mish_kernel,
        out_shape=jax.ShapeDtypeStruct((rows, cols), orig_dtype),
        grid_spec=pltpu.PrefetchScalarGridSpec(
            num_scalar_prefetch=0,
            grid=grid,
            in_specs=[pl.BlockSpec((tile_rows, cols), lambda i: (i, 0))],
            out_specs=pl.BlockSpec((tile_rows, cols), lambda i: (i, 0)),
        ),
        compiler_params=pltpu.CompilerParams(
            dimension_semantics=("parallel",),
            vmem_limit_bytes=_VMEM_LIMIT,
        ),
        cost_estimate=pl.CostEstimate(
            flops=9 * rows * cols,
            transcendentals=2 * rows * cols,
            bytes_accessed=2 * rows * cols * itemsize,
        ),
    )(x2d)

    if pad:
        return out2d.reshape(-1)[:n].reshape(orig_shape)
    return out2d.reshape(orig_shape)


def mish_reference(x):
    xf = x.astype(jnp.float32)
    return (xf * jnp.tanh(jnp.logaddexp(xf, 0.0))).astype(x.dtype)


if __name__ == "__main__":
    key = jax.random.PRNGKey(0)
    k1, k2, k3, k4, k5 = jax.random.split(key, 5)

    # Small NCHW input matching the PyTorch module's typical usage (no-pad path).
    x = jax.random.normal(k1, (2, 4, 16, 16), dtype=jnp.float32)
    y = jax.block_until_ready(mish(x))
    assert y.shape == x.shape and y.dtype == x.dtype
    assert jnp.allclose(y, mish_reference(x), atol=1e-4, rtol=1e-4)

    # Large input: multi-block parallel grid, rebalanced blocks, overflow guard.
    x_big = 8.0 * jax.random.normal(k2, (64, 32, 32, 32), dtype=jnp.float32)
    y_big = jax.block_until_ready(mish(x_big))
    assert y_big.shape == x_big.shape
    assert jnp.allclose(y_big, mish_reference(x_big), atol=1e-4, rtol=1e-4)
    assert bool(jnp.all(jnp.isfinite(y_big)))

    # Non-multiple-of-128 sizes: tiny (<128) single-block path and pad fallback path.
    x_tiny = jax.random.normal(k3, (3, 5, 7), dtype=jnp.float32)
    y_tiny = jax.block_until_ready(mish(x_tiny))
    assert jnp.allclose(y_tiny, mish_reference(x_tiny), atol=1e-4, rtol=1e-4)

    x_odd = jax.random.normal(k4, (17, 33), dtype=jnp.float32)
    y_odd = jax.block_until_ready(mish(x_odd))
    assert jnp.allclose(y_odd, mish_reference(x_odd), atol=1e-4, rtol=1e-4)

    # bf16 path exercising the dtype-aware (16, 128) sublane rounding.
    x_bf16 = jax.random.normal(k5, (4, 256, 16), dtype=jnp.bfloat16)
    y_bf16 = jax.block_until_ready(mish(x_bf16))
    assert y_bf16.dtype == jnp.bfloat16
    assert jnp.allclose(y_bf16.astype(jnp.float32),
                        mish_reference(x_bf16).astype(jnp.float32),
                        atol=2e-2, rtol=2e-2)

    print("KERNEL_OK")
</pallas_src>

<mosaic_0001>
module attributes {stable_mosaic.version = 11 : i64} {
  func.func @_mish_kernel(%arg0: i32, %arg1: memref<1x2048xf32, #tpu.memory_space<vmem>>, %arg2: memref<1x2048xf32, #tpu.memory_space<vmem>>) attributes {dimension_semantics = [#tpu.dimension_semantics<parallel>], iteration_bounds = array<i64: 1>, scalar_prefetch = 0 : i64, scratch_operands = 0 : i64, tpu.core_type = #tpu.core_type<tc>, window_params = [{transform_indices = @transform_0, window_bounds = array<i64: 1, 2048>}, {transform_indices = @transform_1, window_bounds = array<i64: 1, 2048>}]} {
    %c0 = arith.constant 0 : index
    %c0_0 = arith.constant 0 : index
    %0 = vector.load %arg1[%c0, %c0_0] : memref<1x2048xf32, #tpu.memory_space<vmem>>, vector<1x2048xf32>
    %cst = arith.constant 2.000000e+01 : f32
    %1 = vector.broadcast %cst : f32 to vector<1x2048xf32>
    %2 = arith.minimumf %0, %1 : vector<1x2048xf32>
    %3 = math.exp %2 : vector<1x2048xf32>
    %cst_1 = arith.constant 2.000000e+00 : f32
    %4 = vector.broadcast %cst_1 : f32 to vector<1x2048xf32>
    %5 = arith.addf %3, %4 : vector<1x2048xf32>
    %6 = arith.mulf %3, %5 : vector<1x2048xf32>
    %cst_2 = arith.constant 2.000000e+00 : f32
    %7 = vector.broadcast %cst_2 : f32 to vector<1x2048xf32>
    %8 = arith.addf %6, %7 : vector<1x2048xf32>
    %9 = tpu.reciprocal %8 {approx = true} : vector<1x2048xf32> -> vector<1x2048xf32>
    %10 = arith.mulf %8, %9 : vector<1x2048xf32>
    %cst_3 = arith.constant 2.000000e+00 : f32
    %11 = vector.broadcast %cst_3 : f32 to vector<1x2048xf32>
    %12 = arith.subf %11, %10 : vector<1x2048xf32>
    %13 = arith.mulf %9, %12 : vector<1x2048xf32>
    %14 = arith.mulf %6, %13 : vector<1x2048xf32>
    %15 = arith.mulf %0, %14 : vector<1x2048xf32>
    %c0_4 = arith.constant 0 : index
    %c0_5 = arith.constant 0 : index
    %16 = vector.load %arg2[%c0_4, %c0_5] : memref<1x2048xf32, #tpu.memory_space<vmem>>, vector<1x2048xf32>
    tpu.vector_store %arg2[%c0_4, %c0_5], %15 {strides = array<i32>} : memref<1x2048xf32, #tpu.memory_space<vmem>>, vector<1x2048xf32>,
    return
  }
  func.func @transform_0(%arg0: i32) -> (i32, i32) {
    %c0_i32 = arith.constant 0 : i32
    %c0_i32_0 = arith.constant 0 : i32
    return %arg0, %c0_i32 : i32, i32
  }
  func.func @transform_1(%arg0: i32) -> (i32, i32) {
    %c0_i32 = arith.constant 0 : i32
    %c0_i32_0 = arith.constant 0 : i32
    return %arg0, %c0_i32 : i32, i32
  }
}

</mosaic_0001>

<bundles_post_ra>
// kernel: tpu_custom_call.1
= control target key start
LH: loop header
LB: loop body
LE: loop exit
PB: predicated region body
PF: predicated region fallthrough
CT: control target
= control target key end

     0   :  { %6 = vsyncpa [#allocation3], 0  ;;  %s136_s0 = inlined_call_operand.hbm [shape: f32[1,2048], index: 0, kind: input, shape index: {}]   ;;  %s137_s1 = inlined_call_operand.hbm [shape: f32[1,2048], index: 1, kind: output, shape index: {}]  }
   0x1   :  { %7 = vsyncpa [#allocation4], 0  ;;  %s118_s6 = smov [#allocation2]  }
   0x2   :  { %s14_s7 = sshll.u32 %s118_s6, 4  ;;  %s15_s7 = int_to_ptr.vmem [resolvable:$true] %s14_s7 }
   0x3   :  { %s82_s8 = scalar_lea.vmem %s15_s7, 256  ;;  %p87_p1 = scmp.lt.s32.totalorder %s15_s7, %s15_s7 }
   0x4   :  { %p83_p0 = scmp.ne.s32.totalorder %s15_s7, %s82_s8  ;;  %p88_p2 = scmp.lt.s32.totalorder %s82_s8, %s82_s8 }
   0x6   :  { %p89_p3 = por %p88_p2, %p87_p1 }
   0x8   :  { %p90_p4 = pnand %p89_p3, %p83_p0 }
   0xa   :  { %93 = shalt.err (!%p90_p4)
}
   0xb   :  { %17 = dma.hbm_to_vmem [thread:$0]  %s136_s0, 256, %s15_s7, [#allocation3]  }
   0xc   :  { %114 = dma.done.wait [#allocation3], 256  }
   0xd   :  { %115 = vsyncadd [#allocation3], 4294967040  ;;  %v21_v0 = vld [vmem:[#allocation2] sm:$0xff]  ;;  %v22_v1 = vld [vmem:[#allocation2 + $0x8] sm:$0xff]  ;;  %s119_s0 = smov [#allocation5]  }
   0xe   :  { %v23_v2 = vmin.f32 %v21_v0, 20.0  ;;  %v24_v3 = vmin.f32 %v22_v1, 20.0  ;;  %s55_s11 = sshll.u32 %s119_s0, 4  ;;  %s56_s11 = int_to_ptr.vmem [resolvable:$true] %s55_s11 }
   0xf   :  { %s94_s12 = scalar_lea.vmem %s56_s11, 256  ;;  %p99_p6 = scmp.lt.s32.totalorder %s56_s11, %s56_s11 }
  0x10   :  { %v25_v4 = vmul.f32 1.442695, %v23_v2  ;;  %v27_v5 = vmul.f32 1.442695, %v24_v3  ;;  %p95_p5 = scmp.ne.s32.totalorder %s56_s11, %s94_s12  ;;  %p100_p7 = scmp.lt.s32.totalorder %s94_s12, %s94_s12 }
  0x12   :  { %66 = vpow2.f32 %v25_v4  ;;  %p101_p8 = por %p100_p7, %p99_p6 }
  0x13   :  { %68 = vpow2.f32 %v27_v5 }
  0x14   :  { %p102_p9 = pnand %p101_p8, %p95_p5 }
  0x1f   :  { %v67_v6 = vpop.eup %66 }
  0x20   :  { %v69_v7 = vpop.eup %68  ;;  %v29_v8 = vadd.f32 2.0, %v67_v6 }
  0x21   :  { %v30_v9 = vadd.f32 2.0, %v69_v7 }
  0x22   :  { %v31_v10 = vmul.f32 %v67_v6, %v29_v8 }
  0x23   :  { %v32_v11 = vmul.f32 %v69_v7, %v30_v9 }
  0x24   :  { %v33_v12 = vadd.f32 2.0, %v31_v10 }
  0x25   :  { %v34_v13 = vadd.f32 2.0, %v32_v11 }
  0x26   :  { %70 = vrcp.f32 %v33_v12 }
  0x27   :  { %72 = vrcp.f32 %v34_v13 }
  0x33   :  { %v71_v14 = vpop.eup %70 }
  0x34   :  { %v73_v15 = vpop.eup %72  ;;  %v37_v16 = vmul.f32 %v71_v14, %v33_v12 }
  0x35   :  { %v38_v17 = vmul.f32 %v73_v15, %v34_v13 }
  0x36   :  { %v39_v18 = vsub.f32 2.0, %v37_v16 }
  0x37   :  { %v40_v19 = vsub.f32 2.0, %v38_v17 }
  0x38   :  { %v41_v20 = vmul.f32 %v71_v14, %v39_v18 }
  0x39   :  { %v42_v21 = vmul.f32 %v73_v15, %v40_v19 }
  0x3a   :  { %v43_v22 = vmul.f32 %v41_v20, %v31_v10 }
  0x3b   :  { %v44_v23 = vmul.f32 %v42_v21, %v32_v11 }
  0x3c   :  { %v45_v24 = vmul.f32 %v43_v22, %v21_v0 }
  0x3d   :  { %v46_v25 = vmul.f32 %v44_v23, %v22_v1 }
  0x3e   :  { %47 = vst [vmem:[#allocation5] sm:$0xff] %v45_v24 }
  0x3f   :  { %48 = vst [vmem:[#allocation5 + $0x8] sm:$0xff] %v46_v25 }
  0x40   :  { %105 = shalt.err (!%p102_p9)
}
  0x41   :  { %58 = dma.vmem_to_hbm [thread:$0]  %s56_s11, 256, %s137_s1, [#allocation4]  }
  0x42   :  { %116 = dma.done.wait [#allocation4], 256  }
  0x43   :  { %117 = vsyncadd [#allocation4], 4294967040 }
  0x44   :  { %62 = vsyncpa [#allocation3], 1 }
  0x45   :  { %63 = vsyncpa [#allocation4], 1 }

</bundles_post_ra>
